<compile_context>
chip_gen: v6e
topology: v6e:2x2x1
jax: 0.10.0
libtpu: 0.0.40
codegen_flags: <defaults>
</compile_context>

<pallas_src>
import functools

import jax
import jax.numpy as jnp
from jax import lax
from jax.experimental import pallas as pl
from jax.experimental.pallas import tpu as pltpu

IN_DIM = 16
HIDDEN = [32, 32]
OUT_DIM = 8
LN_EPS = 1e-5

# ---- column layout of the packed (32, 128) parameter slab -------------------
_W0_C0, _W0_C1 = 0, IN_DIM                      # W0: rows 0:32, cols  0:16
_W1_C0, _W1_C1 = _W0_C1, _W0_C1 + HIDDEN[0]     # W1: rows 0:32, cols 16:48
_W2_C0, _W2_C1 = _W1_C1, _W1_C1 + HIDDEN[1]     # W2: rows 0:8 , cols 48:80
_B0_C = _W2_C1                                  # b0   : rows 0:32, col 80
_G_C = _B0_C + 1                                # gamma: rows 0:32, col 81
_BE_C = _G_C + 1                                # beta : rows 0:32, col 82
_B1_C = _BE_C + 1                               # b1   : rows 0:32, col 83
_B2_C = _B1_C + 1                               # b2   : rows 0:8 , col 84
_P_ROWS = HIDDEN[0]                             # 32
_P_COLS = 128                                   # lane-aligned slab width


def mlp_adaptor_kernel(x_ref, p_ref, o_ref):
    """One batch tile: x_ref (16, tb), p_ref (32, 128) params, o_ref (8, tb)."""
    P = p_ref[...]                                   # single resident slab
    w0 = P[:, _W0_C0:_W0_C1]                         # (32, 16)
    w1 = P[:, _W1_C0:_W1_C1]                         # (32, 32)
    w2 = P[0:OUT_DIM, _W2_C0:_W2_C1]                 # (8, 32)
    b0 = P[:, _B0_C:_B0_C + 1]                       # (32, 1), broadcasts over lanes
    g = P[:, _G_C:_G_C + 1]
    be = P[:, _BE_C:_BE_C + 1]
    b1 = P[:, _B1_C:_B1_C + 1]
    b2 = P[0:OUT_DIM, _B2_C:_B2_C + 1]               # (8, 1)

    # x arrives batch-on-lanes; upcast (free VPU cast; enables bf16 streaming).
    x = x_ref[...].astype(jnp.float32)               # (16, tb)

    # Linear(16,32) + ReLU
    h = jnp.dot(w0, x, preferred_element_type=jnp.float32) + b0    # (32, tb)
    h = jnp.maximum(h, 0.0)

    # LayerNorm(32) over the feature axis (now the sublane axis)
    mu = jnp.mean(h, axis=0, keepdims=True)                        # (1, tb)
    var = jnp.mean((h - mu) * (h - mu), axis=0, keepdims=True)
    h = (h - mu) * lax.rsqrt(var + LN_EPS) * g + be

    # Linear(32,32) + ReLU
    h = jnp.dot(w1, h, preferred_element_type=jnp.float32) + b1    # (32, tb)
    h = jnp.maximum(h, 0.0)

    # Linear(32,8)
    o = jnp.dot(w2, h, preferred_element_type=jnp.float32) + b2    # (8, tb)
    o_ref[...] = o.astype(o_ref.dtype)


def _round_up(n, m):
    return ((n + m - 1) // m) * m


def _pick_tiling(B, max_tb):
    """Padded batch + lane tile (both multiples of 128); >=2 steps when possible."""
    bp = _round_up(B, 128)
    if bp <= 128:
        return bp, bp                       # tiny batch: single step
    if bp <= 2 * max_tb:
        bp = _round_up(B, 256)
        return bp, bp // 2                  # exactly 2 steps -> both v7x TCs busy
    tb = max_tb
    return _round_up(B, tb), tb             # large batch: big fixed tiles


def pack_params(params):
    """Pack PyTorch-layout params into one (32, 128) f32 slab."""
    w0, b0, g, beta, w1, b1, w2, b2 = params
    P = jnp.zeros((_P_ROWS, _P_COLS), jnp.float32)
    P = P.at[:, _W0_C0:_W0_C1].set(w0.astype(jnp.float32))
    P = P.at[:, _W1_C0:_W1_C1].set(w1.astype(jnp.float32))
    P = P.at[0:OUT_DIM, _W2_C0:_W2_C1].set(w2.astype(jnp.float32))
    P = P.at[:, _B0_C].set(b0.astype(jnp.float32))
    P = P.at[:, _G_C].set(g.astype(jnp.float32))
    P = P.at[:, _BE_C].set(beta.astype(jnp.float32))
    P = P.at[:, _B1_C].set(b1.astype(jnp.float32))
    P = P.at[0:OUT_DIM, _B2_C].set(b2.astype(jnp.float32))
    return P


@functools.partial(jax.jit, static_argnames=("max_tb",))
def mlp_adaptor(x, packed_params, *, max_tb=4096):
    """x: [B, 16] float32 (or bfloat16). Returns [B, 8] float32."""
    B, D = x.shape
    assert D == IN_DIM
    bp, tb = _pick_tiling(B, max_tb)

    # Batch-on-lanes layout (layout plumbing only); zero-pad ragged batches.
    xt = x.T                                           # (16, B)
    if bp != B:
        xt = jnp.pad(xt, ((0, 0), (0, bp - B)))

    grid = (bp // tb,)
    itemsize = jnp.dtype(xt.dtype).itemsize
    cost = pl.CostEstimate(
        flops=2 * bp * (IN_DIM * HIDDEN[0] + HIDDEN[0] * HIDDEN[1]
                        + HIDDEN[1] * OUT_DIM),
        transcendentals=bp,                            # one rsqrt per column
        bytes_accessed=(IN_DIM * bp * itemsize + OUT_DIM * bp * 4
                        + _P_ROWS * _P_COLS * 4),
    )

    out_t = pl.pallas_call(
        mlp_adaptor_kernel,
        out_shape=jax.ShapeDtypeStruct((OUT_DIM, bp), jnp.float32),
        grid_spec=pltpu.PrefetchScalarGridSpec(
            num_scalar_prefetch=0,
            grid=grid,
            in_specs=[
                pl.BlockSpec((IN_DIM, tb), lambda i: (0, i)),          # x tile
                pl.BlockSpec((_P_ROWS, _P_COLS), lambda i: (0, 0)),    # param slab
            ],
            out_specs=pl.BlockSpec((OUT_DIM, tb), lambda i: (0, i)),
        ),
        compiler_params=pltpu.CompilerParams(
            dimension_semantics=("parallel",)),
        cost_estimate=cost,
    )(xt, packed_params)

    return out_t.T[:B]


def init_params(key):
    """Deterministic synthetic init, PyTorch layout: W (out,in), b (out,)."""
    ks = jax.random.split(key, 6)

    def linear(kw, kb, fan_in, fan_out):
        bound = 1.0 / (fan_in ** 0.5)
        w = jax.random.uniform(kw, (fan_out, fan_in), jnp.float32, -bound, bound)
        b = jax.random.uniform(kb, (fan_out,), jnp.float32, -bound, bound)
        return w, b

    w0, b0 = linear(ks[0], ks[1], IN_DIM, HIDDEN[0])
    w1, b1 = linear(ks[2], ks[3], HIDDEN[0], HIDDEN[1])
    w2, b2 = linear(ks[4], ks[5], HIDDEN[1], OUT_DIM)
    gamma = jnp.ones((HIDDEN[0],), jnp.float32)
    beta = jnp.zeros((HIDDEN[0],), jnp.float32)
    return (w0, b0, gamma, beta, w1, b1, w2, b2)


def mlp_adaptor_ref(x, params):
    w0, b0, g, beta, w1, b1, w2, b2 = params
    h = jnp.maximum(x @ w0.T + b0, 0.0)
    mu = jnp.mean(h, axis=-1, keepdims=True)
    var = jnp.mean((h - mu) ** 2, axis=-1, keepdims=True)
    h = (h - mu) / jnp.sqrt(var + LN_EPS) * g + beta
    h = jnp.maximum(h @ w1.T + b1, 0.0)
    return h @ w2.T + b2


if __name__ == "__main__":
    key = jax.random.PRNGKey(0)
    kx, kp = jax.random.split(key)
    B = 300  # small, not 128-aligned -> exercises pad-to-512 and a 2-step grid
    x = jax.random.normal(kx, (B, IN_DIM), jnp.float32)
    params = init_params(kp)
    packed = pack_params(params)

    out = mlp_adaptor(x, packed)
    out = jax.block_until_ready(out)

    ref = mlp_adaptor_ref(x, params)
    assert out.shape == (B, OUT_DIM)
    assert jnp.allclose(out, ref, atol=1e-4, rtol=1e-4), "mismatch vs JAX reference"
    print("KERNEL_OK")
</pallas_src>

<mosaic_0001>
module attributes {stable_mosaic.version = 11 : i64} {
  func.func @mlp_adaptor_kernel(%arg0: i32, %arg1: memref<16x256xf32, #tpu.memory_space<vmem>>, %arg2: memref<32x128xf32, #tpu.memory_space<vmem>>, %arg3: memref<8x256xf32, #tpu.memory_space<vmem>>) attributes {dimension_semantics = [#tpu.dimension_semantics<parallel>], iteration_bounds = array<i64: 2>, scalar_prefetch = 0 : i64, scratch_operands = 0 : i64, tpu.core_type = #tpu.core_type<tc>, window_params = [{transform_indices = @transform_0, window_bounds = array<i64: 16, 256>}, {pipeline_mode = #tpu.pipeline_mode<synchronous>, transform_indices = @transform_1, window_bounds = array<i64: 32, 128>}, {transform_indices = @transform_2, window_bounds = array<i64: 8, 256>}]} {
    %c0 = arith.constant 0 : index
    %c0_0 = arith.constant 0 : index
    %0 = vector.load %arg2[%c0, %c0_0] : memref<32x128xf32, #tpu.memory_space<vmem>>, vector<32x128xf32>
    %1 = vector.extract_strided_slice %0 {offsets = [0, 0], sizes = [32, 16], strides = [1, 1]} : vector<32x128xf32> to vector<32x16xf32>
    %2 = vector.extract_strided_slice %0 {offsets = [0, 16], sizes = [32, 32], strides = [1, 1]} : vector<32x128xf32> to vector<32x32xf32>
    %3 = vector.extract_strided_slice %0 {offsets = [0, 48], sizes = [8, 32], strides = [1, 1]} : vector<32x128xf32> to vector<8x32xf32>
    %4 = vector.extract_strided_slice %0 {offsets = [0, 80], sizes = [32, 1], strides = [1, 1]} : vector<32x128xf32> to vector<32x1xf32>
    %5 = vector.extract_strided_slice %0 {offsets = [0, 81], sizes = [32, 1], strides = [1, 1]} : vector<32x128xf32> to vector<32x1xf32>
    %6 = vector.extract_strided_slice %0 {offsets = [0, 82], sizes = [32, 1], strides = [1, 1]} : vector<32x128xf32> to vector<32x1xf32>
    %7 = vector.extract_strided_slice %0 {offsets = [0, 83], sizes = [32, 1], strides = [1, 1]} : vector<32x128xf32> to vector<32x1xf32>
    %8 = vector.extract_strided_slice %0 {offsets = [0, 84], sizes = [8, 1], strides = [1, 1]} : vector<32x128xf32> to vector<8x1xf32>
    %c0_1 = arith.constant 0 : index
    %c0_2 = arith.constant 0 : index
    %9 = vector.load %arg1[%c0_1, %c0_2] : memref<16x256xf32, #tpu.memory_space<vmem>>, vector<16x256xf32>
    %cst = arith.constant dense<0.000000e+00> : vector<32x256xf32>
    %10 = tpu.matmul %1, %9, %cst {dimension_numbers = #tpu.dot_dimension_numbers<[1], [0], [0], [1], [0, 0, 1, 1], [], []>} : vector<32x16xf32>, vector<16x256xf32>, vector<32x256xf32> -> vector<32x256xf32>
    %11 = vector.broadcast %4 : vector<32x1xf32> to vector<32x256xf32>
    %12 = arith.addf %10, %11 : vector<32x256xf32>
    %cst_3 = arith.constant 0.000000e+00 : f32
    %13 = vector.broadcast %cst_3 : f32 to vector<32x256xf32>
    %14 = arith.maximumf %12, %13 : vector<32x256xf32>
    %cst_4 = arith.constant dense<0.000000e+00> : vector<256xf32>
    %15 = vector.multi_reduction <add>, %14, %cst_4 [0] : vector<32x256xf32> to vector<256xf32>
    %16 = vector.shape_cast %15 : vector<256xf32> to vector<1x256xf32>
    %cst_5 = arith.constant 3.200000e+01 : f32
    %17 = vector.broadcast %cst_5 : f32 to vector<1x256xf32>
    %18 = arith.divf %16, %17 : vector<1x256xf32>
    %19 = vector.broadcast %18 : vector<1x256xf32> to vector<32x256xf32>
    %20 = arith.subf %14, %19 : vector<32x256xf32>
    %21 = vector.broadcast %18 : vector<1x256xf32> to vector<32x256xf32>
    %22 = arith.subf %14, %21 : vector<32x256xf32>
    %23 = arith.mulf %20, %22 : vector<32x256xf32>
    %cst_6 = arith.constant dense<0.000000e+00> : vector<256xf32>
    %24 = vector.multi_reduction <add>, %23, %cst_6 [0] : vector<32x256xf32> to vector<256xf32>
    %25 = vector.shape_cast %24 : vector<256xf32> to vector<1x256xf32>
    %cst_7 = arith.constant 3.200000e+01 : f32
    %26 = vector.broadcast %cst_7 : f32 to vector<1x256xf32>
    %27 = arith.divf %25, %26 : vector<1x256xf32>
    %28 = vector.broadcast %18 : vector<1x256xf32> to vector<32x256xf32>
    %29 = arith.subf %14, %28 : vector<32x256xf32>
    %cst_8 = arith.constant 9.99999974E-6 : f32
    %30 = vector.broadcast %cst_8 : f32 to vector<1x256xf32>
    %31 = arith.addf %27, %30 : vector<1x256xf32>
    %32 = math.rsqrt %31 : vector<1x256xf32>
    %33 = vector.broadcast %32 : vector<1x256xf32> to vector<32x256xf32>
    %34 = arith.mulf %29, %33 : vector<32x256xf32>
    %35 = vector.broadcast %5 : vector<32x1xf32> to vector<32x256xf32>
    %36 = arith.mulf %34, %35 : vector<32x256xf32>
    %37 = vector.broadcast %6 : vector<32x1xf32> to vector<32x256xf32>
    %38 = arith.addf %36, %37 : vector<32x256xf32>
    %cst_9 = arith.constant dense<0.000000e+00> : vector<32x256xf32>
    %39 = tpu.matmul %2, %38, %cst_9 {dimension_numbers = #tpu.dot_dimension_numbers<[1], [0], [0], [1], [0, 0, 1, 1], [], []>} : vector<32x32xf32>, vector<32x256xf32>, vector<32x256xf32> -> vector<32x256xf32>
    %40 = vector.broadcast %7 : vector<32x1xf32> to vector<32x256xf32>
    %41 = arith.addf %39, %40 : vector<32x256xf32>
    %cst_10 = arith.constant 0.000000e+00 : f32
    %42 = vector.broadcast %cst_10 : f32 to vector<32x256xf32>
    %43 = arith.maximumf %41, %42 : vector<32x256xf32>
    %cst_11 = arith.constant dense<0.000000e+00> : vector<8x256xf32>
    %44 = tpu.matmul %3, %43, %cst_11 {dimension_numbers = #tpu.dot_dimension_numbers<[1], [0], [0], [1], [0, 0, 1, 1], [], []>} : vector<8x32xf32>, vector<32x256xf32>, vector<8x256xf32> -> vector<8x256xf32>
    %45 = vector.broadcast %8 : vector<8x1xf32> to vector<8x256xf32>
    %46 = arith.addf %44, %45 : vector<8x256xf32>
    %c0_12 = arith.constant 0 : index
    %c0_13 = arith.constant 0 : index
    %47 = vector.load %arg3[%c0_12, %c0_13] : memref<8x256xf32, #tpu.memory_space<vmem>>, vector<8x256xf32>
    tpu.vector_store %arg3[%c0_12, %c0_13], %46 {strides = array<i32>} : memref<8x256xf32, #tpu.memory_space<vmem>>, vector<8x256xf32>,
    return
  }
  func.func @transform_0(%arg0: i32) -> (i32, i32) {
    %c0_i32 = arith.constant 0 : i32
    %c0_i32_0 = arith.constant 0 : i32
    return %c0_i32, %arg0 : i32, i32
  }
  func.func @transform_1(%arg0: i32) -> (i32, i32) {
    %c0_i32 = arith.constant 0 : i32
    %c0_i32_0 = arith.constant 0 : i32
    %c0_i32_1 = arith.constant 0 : i32
    return %c0_i32, %c0_i32_0 : i32, i32
  }
  func.func @transform_2(%arg0: i32) -> (i32, i32) {
    %c0_i32 = arith.constant 0 : i32
    %c0_i32_0 = arith.constant 0 : i32
    return %c0_i32, %arg0 : i32, i32
  }
}

</mosaic_0001>

<bundles_post_ra>
// kernel: mlp_adaptor.1
= control target key start
LH: loop header
LB: loop body
LE: loop exit
PB: predicated region body
PF: predicated region fallthrough
CT: control target
= control target key end

     0   :  { %s811_s9 = smov 0   ;;  %s813_s10 = smov 0   ;;  %s903_s0 = inlined_call_operand.vmem [shape: f32[16,512], index: 0, kind: input, shape index: {}]   ;;  %s904_s1 = inlined_call_operand.vmem [shape: f32[32,128], index: 1, kind: input, shape index: {}]   ;;  %s905_s2 = inlined_call_operand.vmem [shape: f32[8,512], index: 2, kind: output, shape index: {}]  }
   0x1   :  { %s815_s11 = smov 0  }
   0x2 LB: > { %s696_s12 = sadd.s32 4294967295, %s786_s11   ;;  %s828_s13 = sadd.s32 1, %s786_s11   ;;  %s786_s11 = sphi %s815_s11, %s908_s11   ;;  %s782_s10 = sphi %s813_s10, %s907_s10   ;;  %s778_s9 = sphi %s811_s9, %s906_s9  }
   0x3   : > { %s16_s14 = ssub.s32 %s786_s11, %s828_s13  ;;  %s19_s15 = sadd.s32 1, %s782_s10 }
   0x4   : > { %p17_p0 = scmp.eq.s32.totalorder %s16_s14, 0  ;;  %p26_p1 = scmp.ne.s32.totalorder %s782_s10, %s778_s9 }
   0x5   : > { %p27_p2 = scmp.eq.s32.totalorder %s786_s11, 0  ;;  %p699_p4 = scmp.ge.s32.totalorder %s786_s11, 2 }
   0x6   : > { %s837_s16 = scalar_select %p17_p0, %s782_s10, %s19_s15  }
   0x7   : > { %p28_p3 = por %p27_p2, %p26_p1  ;;  %102 = sbr.rel (%p699_p4) target bundleno = 18 (0x12), region = 20 }
   0xc   : > { %105 = sbr.rel (!%p28_p3) target bundleno = 18 (0x12), region = 24  ;;  %s107_s17 = sand.u32 (%p28_p3), 1, %s782_s10  }
   0xd   : > { %s718_s18 = sshll.u32 (%p28_p3), %s786_s11, 4  ;;  %s700_s19 = sshll.u32 (%p28_p3), %s107_s17, 5 }
   0xe   : > { %s112_s22 = scalar_lea.vmem (%p28_p3), %s903_s0, %s718_s18  ;;  %s109_s23 = scalar_lea.vmem (%p28_p3), [#allocation2], %s700_s19 }
   0xf   : > { %v125_v0 = vld [vmem:[%s112_s22] sm:$0xff] (%p28_p3)  ;;  %v127_v1 = vld [vmem:[%s112_s22 + $0x8] sm:$0xff] (%p28_p3) }
  0x10   : > { %v129_v2 = vld [vmem:[%s112_s22 + $0x20] sm:$0xff] (%p28_p3)  ;;  %126 = vst [vmem:[%s109_s23] sm:$0xff] (%p28_p3), %v125_v0  ;;  %128 = vst [vmem:[%s109_s23 + $0x8] sm:$0xff] (%p28_p3), %v127_v1  ;;  %v131_v3 = vld [vmem:[%s112_s22 + $0x28] sm:$0xff] (%p28_p3) }
  0x11   : > { %130 = vst [vmem:[%s109_s23 + $0x10] sm:$0xff] %v129_v2  ;;  %132 = vst [vmem:[%s109_s23 + $0x18] sm:$0xff] %v131_v3 }
  0x12 PF: > { %p703_p5 = scmp.ge.s32.totalorder %s786_s11, 1  ;;  %p137_p6 = scmp.lt.s32.totalorder %s786_s11, 3 }
  0x14   : > { %p138_p7 = pnand %p703_p5, %p137_p6 }
  0x15   : > { %s144_s24 = sand.u32 (!%p138_p7), 1, %s778_s9   ;;  %s792_s7 = smov (!%p138_p7), 112  }
  0x16   : > { %141 = sbr.rel (%p138_p7) target bundleno = 733 (0x2dd), region = 47  ;;  %s704_s25 = sshll.u32 (!%p138_p7), %s144_s24, 5 }
  0x17   : > { %s146_s30 = scalar_lea.vmem (!%p138_p7), [#allocation2], %s704_s25  ;;  %s794_s8 = smov (!%p138_p7), 80  }
  0x18   : > { %s705_s9 = sshll.u32 (!%p138_p7), %s696_s12, 1 }
  0x19   : > { %p167_p8 = scmp.lt.s32.totalorder (!%p138_p7), %s705_s9, 3 }
  0x1b   : > { %v788_v4 = vmov 0.0   ;;  %v853_v5 = vld [vmem:[%s904_s1] sm:$0xff]  ;;  %v174_v6 = vld [vmem:[%s904_s1 + $0x10] sm:$0xff]  ;;  %v789_v7 = vmov 80   ;;  %v179_v8 = vld [vmem:[%s146_s30 + $0x18] sm:$0xff]  ;;  %vm200_vm0 = vcmask 130048  }
  0x1c   : > { %273 = vmatprep.mubr.f32.mxu0 %v788_v4  ;;  %520 = vmatprep.mubr.f32.mxu1 %v788_v4  ;;  %v178_v9 = vld [vmem:[%s146_s30 + $0x10] sm:$0xff]  ;;  %v177_v10 = vld [vmem:[%s146_s30 + $0x8] sm:$0xff]  ;;  %v176_v11 = vld [vmem:[%s146_s30] sm:$0xff]  ;;  %v790_v14 = vmov 81   ;;  %v791_v15 = vmov 82   ;;  %v793_v16 = vmov 83  }
  0x1d   : > { %751 = vset.pattern.permute.xlu0 %v789_v7  ;;  %752 = vset.pattern.permute.xlu1 %v789_v7  ;;  %v173_v12 = vld [vmem:[%s904_s1 + $0x8] sm:$0xff]  ;;  %v175_v13 = vld [vmem:[%s904_s1 + $0x18] sm:$0xff]  ;;  %vm447_vm1 = vcmask 261120   ;;  %s910_s9 = smov (!%p167_p8, %s705_s9), 3 }
  0x1e   : > { %182 = vperm.xlu0 %751, %v853_v5   ;;  %192 = vperm.xlu1 %752, %v174_v6   ;;  %s706_s14 = sshll.u32 %s910_s9, 3 }
  0x1f   : > { %237 = vmatprep.subr.mxu0 %v179_v8  ;;  %s170_s18 = scalar_lea.vmem %s905_s2, %s706_s14 }
  0x20   : > { %238 = vmatpush1.msra.mxu0 %v178_v9 }
  0x21   : > { %239 = vmatprep.subr.mxu0 %v177_v10 }
  0x22   : > { %240 = vmatpush1.msra.mxu0 %v176_v11  ;;  %187 = vperm.xlu0 %751, %v173_v12  }
  0x23   : > { %707 = vmatmul.mubr.msk.f32.vlgmr.msra.gmra.mxu0 %vm200_vm0, %v853_v5  ;;  %197 = vperm.xlu1 %752, %v175_v13  }
  0x24   : > { %279 = vmatprep.mubr.f32.mxu0 %v788_v4 }
  0x26   : > { %753 = vset.pattern.permute.xlu0 %v790_v14 }
  0x27   : > { %708 = vmatmul.mubr.msk.f32.gmra.mxu0 %vm200_vm0, %v173_v12  ;;  %754 = vset.pattern.permute.xlu1 %v790_v14 }
  0x28   : > { %285 = vmatprep.mubr.f32.mxu0 %v788_v4  ;;  %384 = vperm.xlu1 %754, %v174_v6  }
  0x29   : > { %388 = vperm.xlu0 %753, %v175_v13  }
  0x2b   : > { %709 = vmatmul.mubr.msk.f32.gmra.mxu0 %vm200_vm0, %v174_v6 }
  0x2c   : > { %291 = vmatprep.mubr.f32.mxu0 %v788_v4  ;;  %755 = vset.pattern.permute.xlu1 %v791_v15 }
  0x2d   : > { %412 = vperm.xlu1 %755, %v175_v13   ;;  %380 = vperm.xlu0 %753, %v173_v12  }
  0x2f   : > { %710 = vmatmul.mubr.msk.f32.gmra.mxu0 %vm200_vm0, %v175_v13 }
  0x30   : > { %625 = vmatprep.mubr.f32.mxu0 %v788_v4 }
  0x31   : > { %408 = vperm.xlu1 %755, %v174_v6   ;;  %376 = vperm.xlu0 %753, %v853_v5  }
  0x35   : > { %404 = vperm.xlu1 %755, %v173_v12   ;;  %756 = vset.pattern.permute.xlu0 %v791_v15 }
  0x36   : > { %400 = vperm.xlu0 %756, %v853_v5  }
  0x39   : > { %439 = vrot.lane.b32.xlu1 %v853_v5, %s792_s7 }
  0x3a   : > { %443 = vrot.lane.b32.xlu0 %v174_v6, %s792_s7  ;;  %758 = vset.pattern.permute.xlu1 %v793_v16 }
  0x3b   : > { %757 = vset.pattern.permute.xlu0 %v793_v16 }
  0x3d   : > { %441 = vrot.lane.b32.xlu1 %v173_v12, %s792_s7 }
  0x3e   : > { %436 = vperm.xlu0 %757, %v175_v13  }
  0x41   : > { %445 = vrot.lane.b32.xlu1 %v175_v13, %s792_s7 }
  0x42   : > { %424 = vperm.xlu0 %757, %v853_v5  }
  0x45   : > { %432 = vperm.xlu1 %758, %v174_v6  }
  0x49   : > { %428 = vperm.xlu1 %758, %v173_v12  }
  0x4d   : > { %557 = vrot.lane.b32.xlu1 %v853_v5, %s794_s8 }
  0x99   : > { %v183_v17 = vpop.permute.xlu0 %182  ;;  %v193_v23 = vpop.permute.xlu1 %192 }
  0x9d   : > { %v188_v20 = vpop.permute.xlu0 %187 }
  0x9e   : > { %v198_v36 = vpop.permute.xlu1 %197 }
  0xe3   : > { %v275_v18 = vpop.f32.mrf.mxu0 }
  0xe4   : > { %v276_v25 = vadd.f32 %v275_v18, %v183_v17 }
  0xe5   : > { %v277_v19 = vpop.f32.mrf.mxu0 }
  0xe6   : > { %v278_v28 = vadd.f32 %v277_v19, %v183_v17  ;;  %v298_v32 = vmax.f32 %v276_v25, 0.0 }
  0xe7   : > { %v281_v21 = vpop.f32.mrf.mxu0 }
  0xe8   : > { %v282_v22 = vadd.f32 %v281_v21, %v188_v20  ;;  %v299_v38 = vmax.f32 %v278_v28, 0.0 }
  0xe9   : > { %v283_v24 = vpop.f32.mrf.mxu0 }
  0xea   : > { %v284_v26 = vadd.f32 %v283_v24, %v188_v20  ;;  %v300_v29 = vmax.f32 %v282_v22, 0.0 }
  0xeb   : > { %v287_v27 = vpop.f32.mrf.mxu0 }
  0xec   : > { %v288_v30 = vadd.f32 %v287_v27, %v193_v23  ;;  %v301_v33 = vmax.f32 %v284_v26, 0.0  ;;  %v306_v39 = vadd.f32 %v300_v29, %v298_v32 }
  0xed   : > { %v289_v31 = vpop.f32.mrf.mxu0 }
  0xee   : > { %v302_v34 = vmax.f32 %v288_v30, 0.0  ;;  %v290_v35 = vadd.f32 %v289_v31, %v193_v23  ;;  %v315_v43 = vadd.f32 %v301_v33, %v299_v38 }
  0xef   : > { %v293_v37 = vpop.f32.mrf.mxu0 }
  0xf0   : > { %v303_v40 = vmax.f32 %v290_v35, 0.0  ;;  %v294_v41 = vadd.f32 %v293_v37, %v198_v36  ;;  %v307_v44 = vadd.f32 %v306_v39, %v302_v34 }
  0xf1   : > { %v295_v42 = vpop.f32.mrf.mxu0 }
  0xf2   : > { %v304_v45 = vmax.f32 %v294_v41, 0.0  ;;  %v296_v46 = vadd.f32 %v295_v42, %v198_v36  ;;  %v316_v47 = vadd.f32 %v315_v43, %v303_v40  ;;  %v385_v41 = vpop.permute.xlu1 %384  ;;  %v389_v42 = vpop.permute.xlu0 %388 }
  0xf4   : > { %v308_v48 = vadd.f32 %v307_v44, %v304_v45  ;;  %v305_v49 = vmax.f32 %v296_v46, 0.0 }
  0xf6   : > { %v309_v50 = vrot.slane %v308_v48, 4  ;;  %v317_v51 = vadd.f32 %v316_v47, %v305_v49  ;;  %v413_v43 = vpop.permute.xlu1 %412  ;;  %v381_v44 = vpop.permute.xlu0 %380 }
  0xf8   : > { %v310_v52 = vadd.f32 %v309_v50, %v308_v48  ;;  %v318_v53 = vrot.slane %v317_v51, 4 }
  0xfa   : > { %v311_v54 = vrot.slane %v310_v52, 2  ;;  %v319_v55 = vadd.f32 %v318_v53, %v317_v51 }
  0xfc   : > { %v312_v56 = vadd.f32 %v311_v54, %v310_v52  ;;  %v320_v57 = vrot.slane %v319_v55, 2 }
  0xfe   : > { %v313_v58 = vrot.slane %v312_v56, 1  ;;  %v321_v59 = vadd.f32 %v320_v57, %v319_v55  ;;  %v377_v57 = vpop.permute.xlu0 %376 }
 0x100   : > { %v314_v60 = vadd.f32 %v313_v58, %v312_v56  ;;  %v322_v61 = vrot.slane %v321_v59, 1 }
 0x102   : > { %v325_v62 = vmul.f32 0.03125, %v314_v60  ;;  %v323_v63 = vadd.f32 %v322_v61, %v321_v59 }
 0x104   : > { %v326_v0 = vmul.f32 0.03125, %v323_v63  ;;  %v327_v1 = vsub.f32 %v298_v32, %v325_v62  ;;  %v329_v2 = vsub.f32 %v300_v29, %v325_v62  ;;  %v331_v3 = vsub.f32 %v302_v34, %v325_v62 }
 0x105   : > { %v333_v8 = vsub.f32 %v304_v45, %v325_v62 }
 0x106   : > { %v328_v6 = vsub.f32 %v299_v38, %v326_v0  ;;  %v330_v7 = vsub.f32 %v301_v33, %v326_v0  ;;  %v332_v9 = vsub.f32 %v303_v40, %v326_v0  ;;  %v335_v10 = vmul.f32 %v327_v1, %v327_v1 }
 0x107   : > { %v337_v11 = vmul.f32 %v329_v2, %v329_v2  ;;  %v334_v12 = vsub.f32 %v305_v49, %v326_v0  ;;  %v339_v15 = vmul.f32 %v331_v3, %v331_v3  ;;  %v341_v19 = vmul.f32 %v333_v8, %v333_v8  ;;  %v409_v49 = vpop.permute.xlu1 %408 }
 0x108   : > { %v336_v13 = vmul.f32 %v328_v6, %v328_v6  ;;  %v338_v14 = vmul.f32 %v330_v7, %v330_v7  ;;  %v340_v17 = vmul.f32 %v332_v9, %v332_v9 }
 0x109   : > { %v343_v16 = vadd.f32 %v337_v11, %v335_v10  ;;  %v342_v21 = vmul.f32 %v334_v12, %v334_v12 }
 0x10a   : > { %v352_v18 = vadd.f32 %v338_v14, %v336_v13 }
 0x10b   : > { %v344_v20 = vadd.f32 %v343_v16, %v339_v15  ;;  %v405_v0 = vpop.permute.xlu1 %404 }
 0x10c   : > { %v353_v22 = vadd.f32 %v352_v18, %v340_v17  ;;  %v795_v17 = vmov 84  }
 0x10d   : > { %v345_v23 = vadd.f32 %v344_v20, %v341_v19  ;;  %759 = vset.pattern.permute.xlu0 %v795_v17 }
 0x10e   : > { %v354_v24 = vadd.f32 %v353_v22, %v342_v21  ;;  %554 = vperm.xlu0 %759, %v853_v5  }
 0x10f   : > { %v346_v25 = vrot.slane %v345_v23, 4  ;;  %v440_v13 = vpop.permute.xlu1 %439 }
 0x110   : > { %v355_v26 = vrot.slane %v354_v24, 4 }
 0x111   : > { %v347_v27 = vadd.f32 %v346_v25, %v345_v23 }
 0x112   : > { %v356_v28 = vadd.f32 %v355_v26, %v354_v24 }
 0x113   : > { %v348_v29 = vrot.slane %v347_v27, 2  ;;  %v442_v14 = vpop.permute.xlu1 %441 }
 0x114   : > { %v357_v30 = vrot.slane %v356_v28, 2 }
 0x115   : > { %v349_v31 = vadd.f32 %v348_v29, %v347_v27 }
 0x116   : > { %v358_v32 = vadd.f32 %v357_v30, %v356_v28 }
 0x117   : > { %v350_v33 = vrot.slane %v349_v31, 1  ;;  %v446_v16 = vpop.permute.xlu1 %445 }
 0x118   : > { %v359_v34 = vrot.slane %v358_v32, 1 }
 0x119   : > { %v351_v35 = vadd.f32 %v350_v33, %v349_v31 }
 0x11a   : > { %v360_v36 = vadd.f32 %v359_v34, %v358_v32 }
 0x11b   : > { %v361_v37 = vmul.f32 0.03125, %v351_v35  ;;  %v433_v23 = vpop.permute.xlu1 %432 }
 0x11c   : > { %v362_v38 = vmul.f32 0.03125, %v360_v36 }
 0x11d   : > { %v363_v39 = vadd.f32 1e-05, %v361_v37 }
 0x11e   : > { %v364_v40 = vadd.f32 1e-05, %v362_v38 }
 0x11f   : > { %760 = vrsqrt.f32 %v363_v39  ;;  %v429_v29 = vpop.permute.xlu1 %428 }
 0x120   : > { %762 = vrsqrt.f32 %v364_v40 }
 0x12c   : > { %v761_v45 = vpop.eup %760 }
 0x12d   : > { %v763_v46 = vpop.eup %762  ;;  %v371_v47 = vmul.f32 %v761_v45, %v331_v3  ;;  %v373_v48 = vmul.f32 %v761_v45, %v333_v8  ;;  %v369_v54 = vmul.f32 %v761_v45, %v329_v2  ;;  %v367_v60 = vmul.f32 %v761_v45, %v327_v1 }
 0x12e   : > { %v372_v50 = vmul.f32 %v763_v46, %v332_v9  ;;  %v374_v51 = vmul.f32 %v763_v46, %v334_v12  ;;  %v370_v52 = vmul.f32 %v763_v46, %v330_v7  ;;  %v368_v58 = vmul.f32 %v763_v46, %v328_v6  ;;  %v401_v12 = vpop.permute.xlu0 %400 }
 0x12f   : > { %v397_v53 = vmul.f32 %v389_v42, %v373_v48  ;;  %v395_v59 = vmul.f32 %v385_v41, %v371_v47  ;;  %v393_v63 = vmul.f32 %v381_v44, %v369_v54  ;;  %v391_v9 = vmul.f32 %v377_v57, %v367_v60 }
 0x130   : > { %v396_v55 = vmul.f32 %v385_v41, %v372_v50  ;;  %v398_v56 = vmul.f32 %v389_v42, %v374_v51  ;;  %v394_v61 = vmul.f32 %v381_v44, %v370_v52  ;;  %v392_v3 = vmul.f32 %v377_v57, %v368_v58  ;;  %v558_v44 = vpop.permute.xlu1 %557 }
 0x131   : > { %v421_v10 = vadd.f32 %v413_v43, %v397_v53  ;;  %v419_v8 = vadd.f32 %v409_v49, %v395_v59  ;;  %v417_v2 = vadd.f32 %v405_v0, %v393_v63  ;;  %v415_v1 = vadd.f32 %v401_v12, %v391_v9 }
 0x132   : > { %v422_v62 = vadd.f32 %v413_v43, %v398_v56  ;;  %v420_v11 = vadd.f32 %v409_v49, %v396_v55  ;;  %v418_v7 = vadd.f32 %v405_v0, %v394_v61  ;;  %v416_v6 = vadd.f32 %v401_v12, %v392_v3  ;;  %v444_v15 = vpop.permute.xlu0 %443 }
 0x134   : > { %480 = vmatprep.subr.mxu1 %v422_v62 }
 0x135   : > { %481 = vmatpush1.msra.mxu1 %v421_v10 }
 0x136   : > { %482 = vmatprep.subr.mxu1 %v420_v11  ;;  %v437_v25 = vpop.permute.xlu0 %436 }
 0x137   : > { %483 = vmatpush1.msra.mxu1 %v419_v8 }
 0x138   : > { %484 = vmatprep.subr.mxu1 %v418_v7 }
 0x139   : > { %485 = vmatpush1.msra.mxu1 %v417_v2 }
 0x13a   : > { %486 = vmatprep.subr.mxu1 %v416_v6  ;;  %v425_v32 = vpop.permute.xlu0 %424 }
 0x13b   : > { %487 = vmatpush1.msra.mxu1 %v415_v1 }
 0x13c   : > { %711 = vmatmul.mubr.msk.f32.vlgmr.msra.gmra.mxu1 %vm447_vm1, %v440_v13 }
 0x13d   : > { %526 = vmatprep.mubr.f32.mxu1 %v788_v4 }
 0x140   : > { %712 = vmatmul.mubr.msk.f32.gmra.mxu1 %vm447_vm1, %v442_v14 }
 0x141   : > { %532 = vmatprep.mubr.f32.mxu1 %v788_v4 }
 0x144   : > { %713 = vmatmul.mubr.msk.f32.gmra.mxu1 %vm447_vm1, %v444_v15 }
 0x145   : > { %538 = vmatprep.mubr.f32.mxu1 %v788_v4 }
 0x148   : > { %714 = vmatmul.mubr.msk.f32.gmra.mxu1 %vm447_vm1, %v446_v16 }
 0x189   : > { %v555_v45 = vpop.permute.xlu0 %554 }
 0x1fc   : > { %v522_v18 = vpop.f32.mrf.mxu1 }
 0x1fd   : > { %v523_v38 = vadd.f32 %v522_v18, %v425_v32 }
 0x1fe   : > { %v524_v19 = vpop.f32.mrf.mxu1 }
 0x1ff   : > { %v525_v36 = vadd.f32 %v524_v19, %v425_v32  ;;  %v545_v43 = vmax.f32 %v523_v38, 0.0 }
 0x200   : > { %v528_v20 = vpop.f32.mrf.mxu1 }
 0x201   : > { %v529_v35 = vadd.f32 %v528_v20, %v429_v29  ;;  %v546_v42 = vmax.f32 %v525_v36, 0.0 }
 0x202   : > { %v530_v21 = vpop.f32.mrf.mxu1 }
 0x203   : > { %v531_v33 = vadd.f32 %v530_v21, %v429_v29  ;;  %v547_v41 = vmax.f32 %v529_v35, 0.0 }
 0x204   : > { %v534_v22 = vpop.f32.mrf.mxu1 }
 0x205   : > { %v535_v31 = vadd.f32 %v534_v22, %v433_v23  ;;  %v548_v40 = vmax.f32 %v531_v33, 0.0 }
 0x206   : > { %v536_v24 = vpop.f32.mrf.mxu1 }
 0x207   : > { %v537_v30 = vadd.f32 %v536_v24, %v433_v23  ;;  %v549_v39 = vmax.f32 %v535_v31, 0.0 }
 0x208   : > { %v540_v26 = vpop.f32.mrf.mxu1 }
 0x209   : > { %v541_v27 = vadd.f32 %v540_v26, %v437_v25  ;;  %v550_v37 = vmax.f32 %v537_v30, 0.0 }
 0x20a   : > { %v542_v28 = vpop.f32.mrf.mxu1 }
 0x20b   : > { %v543_v4 = vadd.f32 %v542_v28, %v437_v25  ;;  %v551_v5 = vmax.f32 %v541_v27, 0.0 }
 0x20d   : > { %v552_v34 = vmax.f32 %v543_v4, 0.0 }
 0x20f   : > { %585 = vmatprep.subr.mxu0 %v552_v34 }
 0x210   : > { %586 = vmatpush1.msra.mxu0 %v551_v5 }
 0x211   : > { %587 = vmatprep.subr.mxu0 %v550_v37 }
 0x212   : > { %588 = vmatpush1.msra.mxu0 %v549_v39 }
 0x213   : > { %589 = vmatprep.subr.mxu0 %v548_v40 }
 0x214   : > { %590 = vmatpush1.msra.mxu0 %v547_v41 }
 0x215   : > { %591 = vmatprep.subr.mxu0 %v546_v42 }
 0x216   : > { %592 = vmatpush1.msra.mxu0 %v545_v43 }
 0x217   : > { %715 = vmatmul.mubr.msk.f32.vlgmr.msra.gmra.mxu0 %vm447_vm1, %v558_v44 }
 0x2d7   : > { %v627_v46 = vpop.f32.mrf.mxu0 }
 0x2d8   : > { %v628_v47 = vadd.f32 %v627_v46, %v555_v45 }
 0x2d9   : > { %v629_v48 = vpop.f32.mrf.mxu0 }
 0x2da   : > { %632 = vst [vmem:[%s170_s18] sm:$0xff] %v628_v47  ;;  %v630_v49 = vadd.f32 %v629_v48, %v555_v45 }
 0x2dc   : > { %633 = vst [vmem:[%s170_s18 + $0x8] sm:$0xff] %v630_v49 }
 0x2dd PF: > { %p9_p9 = scmp.ge.s32.totalorder %s828_s13, 4   ;;  %s906_s9 = smov %s782_s10 }
 0x2de   : > { %s907_s10 = smov %s837_s16  ;;  %s908_s11 = smov %s828_s13 }
 0x2df   :  { %11 = sbr.rel (!%p9_p9) target bundleno = 2 (0x2), region = 86 }

</bundles_post_ra>
